<compile_context>
chip_gen: v7x
topology: tpu7x:2x2x1
jax: 0.10.0
libtpu: 0.0.40
codegen_flags: <defaults>
</compile_context>

<pallas_src>
import functools

import jax
import jax.numpy as jnp
from jax.experimental import pallas as pl
from jax.experimental.pallas import tpu as pltpu


def _round_up(x, m):
    return ((x + m - 1) // m) * m


def _make_kernel(tb, nb, n_pad):
    """Flash-style tiled bidirectional CE kernel.

    Inputs are already L2-normalized, scaled by sqrt(inv_temp) and cast to the
    MXU dtype in the wrapper, so logits = row_block @ col_block^T directly.
    """

    def kernel(it_ref, vr_ref, tr_ref, vc_ref, tc_ref, out_ref, l_v2t, l_t2v):
        k = pl.program_id(1)

        @pl.when(k == 0)
        def _init():
            l_v2t[...] = jnp.zeros((tb, 1), jnp.float32)
            l_t2v[...] = jnp.zeros((tb, 1), jnp.float32)

        inv_temp = it_ref[0, 0]  # f32 scalar from SMEM

        vr = vr_ref[...]  # video rows (block i), pre-normalized & pre-scaled
        tr = tr_ref[...]  # text  rows (block i)
        vc = vc_ref[...]  # video cols (block k)
        tc = tc_ref[...]  # text  cols (block k)

        dn = (((1,), (1,)), ((), ()))  # contract the feature dim of both sides
        s_v2t = jax.lax.dot_general(vr, tc, dn, preferred_element_type=jnp.float32)
        s_t2v = jax.lax.dot_general(tr, vc, dn, preferred_element_type=jnp.float32)

        # Fixed-max online sum-of-exp: rows are unit-norm => |logits| <= inv_temp.
        l_v2t[...] += jnp.sum(jnp.exp(s_v2t - inv_temp), axis=1, keepdims=True)
        l_t2v[...] += jnp.sum(jnp.exp(s_t2v - inv_temp), axis=1, keepdims=True)

        @pl.when(k == nb - 1)
        def _finalize():
            # diag[r] = logits[i*tb + r, i*tb + r]; temperature already folded in.
            diag = jnp.sum(vr.astype(jnp.float32) * tr.astype(jnp.float32),
                           axis=1, keepdims=True)
            lv = l_v2t[...]
            lt = l_t2v[...]
            if n_pad:
                # Zero-padded columns each contribute exactly exp(0 - inv_temp).
                pad_corr = n_pad * jnp.exp(-inv_temp)
                lv = lv - pad_corr
                lt = lt - pad_corr
            lse_v2t = inv_temp + jnp.log(lv)
            lse_t2v = inv_temp + jnp.log(lt)
            out_ref[...] = 0.5 * ((lse_v2t - diag) + (lse_t2v - diag))

    return kernel


def _pick_tile_and_vmem(B, Dp, bpe, block_b):
    """Chip-aware row/col tile size and VMEM limit."""
    kind = ""
    try:
        kind = jax.devices()[0].device_kind.lower()
    except Exception:
        pass
    is_v7 = "v7" in kind
    # v7x has 64 MiB VMEM per TensorCore; v5e/v6e have 128 MiB.
    vmem_budget = (48 if is_v7 else 96) * 1024 * 1024

    b_aligned = _round_up(B, 8)
    tb = 512 if block_b is None else int(block_b)
    tb = max(8, min(_round_up(tb, 8), b_aligned))

    # v7x: 2 TensorCores sharded over the "parallel" row axis -> keep >= 2 row
    # blocks when the batch is big enough to split.
    if is_v7 and b_aligned >= 256:
        tb = min(tb, _round_up((b_aligned + 1) // 2, 8))

    def footprint(t):
        # 4 tiled block specs x 2 pipeline buffers + 2 f32 score tiles + slivers.
        return 8 * t * Dp * bpe + 2 * t * t * 4 + 8 * t * 4

    while tb > 8 and footprint(tb) > vmem_budget:
        tb = _round_up(tb // 2, 8)

    vmem_limit = min(vmem_budget + (12 << 20), (60 << 20) if is_v7 else (112 << 20))
    return tb, int(vmem_limit)


@functools.partial(jax.jit, static_argnames=("tb", "Dp", "vmem_limit", "mm_dtype"))
def _infonce_impl(video, text, log_temp, *, tb, Dp, vmem_limit, mm_dtype):
    B, D = video.shape
    Bp = _round_up(B, tb)
    nb = Bp // tb

    inv_temp = jnp.exp(-log_temp.astype(jnp.float32))  # 1 / temperature
    scale = jnp.sqrt(inv_temp)                          # fold temp into both sides

    def prep(x):
        # F.normalize(x, dim=1, eps=1e-12) == x * rsqrt(max(|x|^2, 1e-24))
        x = x.astype(jnp.float32)
        ss = jnp.sum(x * x, axis=1, keepdims=True)
        xn = x * jax.lax.rsqrt(jnp.maximum(ss, 1e-24))
        xn = (xn * scale).astype(mm_dtype)
        if Bp != B or Dp != D:
            xn = jnp.pad(xn, ((0, Bp - B), (0, Dp - D)))  # padded rows are exact 0
        return xn

    v_p = prep(video)
    t_p = prep(text)
    inv_temp_arr = inv_temp.reshape(1, 1)

    kernel = _make_kernel(tb=tb, nb=nb, n_pad=Bp - B)

    out = pl.pallas_call(
        kernel,
        out_shape=jax.ShapeDtypeStruct((Bp, 1), jnp.float32),
        grid=(nb, nb),
        in_specs=[
            pl.BlockSpec((1, 1), lambda i, k: (0, 0),
                         memory_space=pltpu.MemorySpace.SMEM),    # inv_temp scalar
            pl.BlockSpec((tb, Dp), lambda i, k: (i, 0)),          # video row block
            pl.BlockSpec((tb, Dp), lambda i, k: (i, 0)),          # text  row block
            pl.BlockSpec((tb, Dp), lambda i, k: (k, 0)),          # video col block
            pl.BlockSpec((tb, Dp), lambda i, k: (k, 0)),          # text  col block
        ],
        out_specs=pl.BlockSpec((tb, 1), lambda i, k: (i, 0)),
        scratch_shapes=[pltpu.VMEM((tb, 1), jnp.float32)] * 2,    # l per direction
        compiler_params=pltpu.CompilerParams(
            dimension_semantics=("parallel", "arbitrary"),
            vmem_limit_bytes=vmem_limit,
        ),
    )(inv_temp_arr, v_p, t_p, v_p, t_p)

    return jnp.mean(out[:B, 0])


def infonce_loss(video_features, text_features, log_temp, *,
                 block_b=None, mm_dtype=jnp.bfloat16):
    """video_features, text_features: [B, D]; log_temp: scalar. Returns scalar loss.

    mm_dtype: dtype of the MXU operands (default bf16 even for f32 inputs;
    pass jnp.float32 for bit-accurate-to-reference results).
    """
    B, D = video_features.shape
    Dp = max(128, _round_up(D, 128))
    bpe = jnp.dtype(mm_dtype).itemsize
    tb, vmem_limit = _pick_tile_and_vmem(B, Dp, bpe, block_b)
    return _infonce_impl(video_features, text_features,
                         jnp.asarray(log_temp, jnp.float32),
                         tb=tb, Dp=Dp, vmem_limit=vmem_limit, mm_dtype=mm_dtype)


class InfoNCELossPallas:
    """JAX/Pallas equivalent of the PyTorch InfoNCELoss module (non-DDP path)."""

    def __init__(self, temperature: float = 0.07, use_ddp: bool = False):
        self.temperature = temperature
        self.use_ddp = use_ddp  # TODO(synk): DDP all_gather path not implemented.
        # nn.Parameter(torch.log(torch.tensor(temperature))) -- deterministic init.
        self.log_temp = jnp.log(jnp.asarray(temperature, jnp.float32))

    def __call__(self, video_features, text_features, log_temp=None, **kwargs):
        temp = self.log_temp if log_temp is None else log_temp
        return infonce_loss(video_features, text_features, temp, **kwargs)


def _reference(video, text, log_temp):
    """Pure-JAX reference mirroring the PyTorch code (for sanity checking)."""
    v = video / jnp.maximum(jnp.linalg.norm(video, axis=1, keepdims=True), 1e-12)
    t = text / jnp.maximum(jnp.linalg.norm(text, axis=1, keepdims=True), 1e-12)
    logits = (v @ t.T) / jnp.exp(log_temp)
    lse_r = jax.scipy.special.logsumexp(logits, axis=1)
    lse_c = jax.scipy.special.logsumexp(logits, axis=0)
    diag = jnp.diag(logits)
    return 0.5 * (jnp.mean(lse_r - diag) + jnp.mean(lse_c - diag))


if __name__ == "__main__":
    key = jax.random.PRNGKey(0)

    # Primary check: default (bf16 MXU operands) path, B = 8, D = 32.
    B, D = 8, 32
    kv, kt = jax.random.split(key)
    video = jax.random.normal(kv, (B, D), dtype=jnp.float32)
    text = jax.random.normal(kt, (B, D), dtype=jnp.float32)

    loss_mod = InfoNCELossPallas(temperature=0.07)
    loss = loss_mod(video, text)
    jax.block_until_ready(loss)
    ref = _reference(video, text, loss_mod.log_temp)
    assert jnp.allclose(loss, ref, atol=5e-2, rtol=5e-2), (loss, ref)

    # Exactness check of tiling / fixed-max LSE / analytic pad correction with
    # f32 operands, multi-tile grid + padding path (B=20, tb=8 -> pad to 24).
    B2, D2 = 20, 48
    kv2, kt2 = jax.random.split(jax.random.PRNGKey(1))
    video2 = jax.random.normal(kv2, (B2, D2), dtype=jnp.float32)
    text2 = jax.random.normal(kt2, (B2, D2), dtype=jnp.float32)
    loss2 = infonce_loss(video2, text2, loss_mod.log_temp,
                         block_b=8, mm_dtype=jnp.float32)
    jax.block_until_ready(loss2)
    ref2 = _reference(video2, text2, loss_mod.log_temp)
    assert jnp.allclose(loss2, ref2, atol=1e-4, rtol=1e-4), (loss2, ref2)

    # bf16-input path (same bf16 MXU operands).
    loss3 = infonce_loss(video.astype(jnp.bfloat16), text.astype(jnp.bfloat16),
                         loss_mod.log_temp)
    jax.block_until_ready(loss3)
    assert jnp.allclose(loss3, ref, atol=1e-1, rtol=1e-1), (loss3, ref)

    print("KERNEL_OK")
</pallas_src>

<mosaic_0001>
module attributes {stable_mosaic.version = 11 : i64} {
  func.func @kernel(%arg0: i32, %arg1: i32, %arg2: memref<1x1xf32, #tpu.memory_space<smem>>, %arg3: memref<8x128xbf16, #tpu.memory_space<vmem>>, %arg4: memref<8x128xbf16, #tpu.memory_space<vmem>>, %arg5: memref<8x128xbf16, #tpu.memory_space<vmem>>, %arg6: memref<8x128xbf16, #tpu.memory_space<vmem>>, %arg7: memref<8x1xf32, #tpu.memory_space<vmem>>, %arg8: memref<8x1xf32, #tpu.memory_space<vmem>>, %arg9: memref<8x1xf32, #tpu.memory_space<vmem>>) attributes {dimension_semantics = [#tpu.dimension_semantics<parallel>, #tpu.dimension_semantics<arbitrary>], iteration_bounds = array<i64: 1, 1>, scalar_prefetch = 0 : i64, scratch_operands = 2 : i64, tpu.core_type = #tpu.core_type<tc>, window_params = [{transform_indices = @transform_0, window_bounds = array<i64: 1, 1>}, {transform_indices = @transform_1, window_bounds = array<i64: 8, 128>}, {transform_indices = @transform_2, window_bounds = array<i64: 8, 128>}, {transform_indices = @transform_3, window_bounds = array<i64: 8, 128>}, {transform_indices = @transform_4, window_bounds = array<i64: 8, 128>}, {transform_indices = @transform_5, window_bounds = array<i64: 8, 1>}]} {
    %c0_i32 = arith.constant 0 : i32
    %0 = arith.cmpi eq, %arg1, %c0_i32 : i32
    %1 = arith.extui %0 : i1 to i32
    %c0_i32_0 = arith.constant 0 : i32
    %2 = arith.cmpi ne, %1, %c0_i32_0 : i32
    scf.if %2 {
      %cst_23 = arith.constant 0.000000e+00 : f32
      %29 = vector.broadcast %cst_23 : f32 to vector<8x1xf32>
      %c0_24 = arith.constant 0 : index
      %c0_25 = arith.constant 0 : index
      %30 = vector.load %arg8[%c0_24, %c0_25] : memref<8x1xf32, #tpu.memory_space<vmem>>, vector<8x1xf32>
      tpu.vector_store %arg8[%c0_24, %c0_25], %29 {strides = array<i32>} : memref<8x1xf32, #tpu.memory_space<vmem>>, vector<8x1xf32>,
      %cst_26 = arith.constant 0.000000e+00 : f32
      %31 = vector.broadcast %cst_26 : f32 to vector<8x1xf32>
      %c0_27 = arith.constant 0 : index
      %c0_28 = arith.constant 0 : index
      %32 = vector.load %arg9[%c0_27, %c0_28] : memref<8x1xf32, #tpu.memory_space<vmem>>, vector<8x1xf32>
      tpu.vector_store %arg9[%c0_27, %c0_28], %31 {strides = array<i32>} : memref<8x1xf32, #tpu.memory_space<vmem>>, vector<8x1xf32>,
    } else {
    }
    %c0 = arith.constant 0 : index
    %c0_1 = arith.constant 0 : index
    %3 = memref.load %arg2[%c0, %c0_1] : memref<1x1xf32, #tpu.memory_space<smem>>
    %c0_2 = arith.constant 0 : index
    %c0_3 = arith.constant 0 : index
    %4 = vector.load %arg3[%c0_2, %c0_3] : memref<8x128xbf16, #tpu.memory_space<vmem>>, vector<8x128xbf16>
    %c0_4 = arith.constant 0 : index
    %c0_5 = arith.constant 0 : index
    %5 = vector.load %arg4[%c0_4, %c0_5] : memref<8x128xbf16, #tpu.memory_space<vmem>>, vector<8x128xbf16>
    %c0_6 = arith.constant 0 : index
    %c0_7 = arith.constant 0 : index
    %6 = vector.load %arg5[%c0_6, %c0_7] : memref<8x128xbf16, #tpu.memory_space<vmem>>, vector<8x128xbf16>
    %c0_8 = arith.constant 0 : index
    %c0_9 = arith.constant 0 : index
    %7 = vector.load %arg6[%c0_8, %c0_9] : memref<8x128xbf16, #tpu.memory_space<vmem>>, vector<8x128xbf16>
    %cst = arith.constant dense<0.000000e+00> : vector<8x8xf32>
    %8 = tpu.matmul %4, %7, %cst {dimension_numbers = #tpu.dot_dimension_numbers<[1], [1], [0], [0], [0, 0, 1, 0], [], []>} : vector<8x128xbf16>, vector<8x128xbf16>, vector<8x8xf32> -> vector<8x8xf32>
    %cst_10 = arith.constant dense<0.000000e+00> : vector<8x8xf32>
    %9 = tpu.matmul %5, %6, %cst_10 {dimension_numbers = #tpu.dot_dimension_numbers<[1], [1], [0], [0], [0, 0, 1, 0], [], []>} : vector<8x128xbf16>, vector<8x128xbf16>, vector<8x8xf32> -> vector<8x8xf32>
    %c0_11 = arith.constant 0 : index
    %c0_12 = arith.constant 0 : index
    %10 = vector.load %arg8[%c0_11, %c0_12] : memref<8x1xf32, #tpu.memory_space<vmem>>, vector<8x1xf32>
    %11 = vector.broadcast %3 : f32 to vector<8x8xf32>
    %12 = arith.subf %8, %11 : vector<8x8xf32>
    %13 = math.exp %12 : vector<8x8xf32>
    %cst_13 = arith.constant dense<0.000000e+00> : vector<8xf32>
    %14 = vector.multi_reduction <add>, %13, %cst_13 [1] : vector<8x8xf32> to vector<8xf32>
    %15 = vector.shape_cast %14 : vector<8xf32> to vector<8x1xf32>
    %16 = arith.addf %10, %15 : vector<8x1xf32>
    %c0_14 = arith.constant 0 : index
    %c0_15 = arith.constant 0 : index
    %17 = vector.load %arg8[%c0_14, %c0_15] : memref<8x1xf32, #tpu.memory_space<vmem>>, vector<8x1xf32>
    tpu.vector_store %arg8[%c0_14, %c0_15], %16 {strides = array<i32>} : memref<8x1xf32, #tpu.memory_space<vmem>>, vector<8x1xf32>,
    %c0_16 = arith.constant 0 : index
    %c0_17 = arith.constant 0 : index
    %18 = vector.load %arg9[%c0_16, %c0_17] : memref<8x1xf32, #tpu.memory_space<vmem>>, vector<8x1xf32>
    %19 = vector.broadcast %3 : f32 to vector<8x8xf32>
    %20 = arith.subf %9, %19 : vector<8x8xf32>
    %21 = math.exp %20 : vector<8x8xf32>
    %cst_18 = arith.constant dense<0.000000e+00> : vector<8xf32>
    %22 = vector.multi_reduction <add>, %21, %cst_18 [1] : vector<8x8xf32> to vector<8xf32>
    %23 = vector.shape_cast %22 : vector<8xf32> to vector<8x1xf32>
    %24 = arith.addf %18, %23 : vector<8x1xf32>
    %c0_19 = arith.constant 0 : index
    %c0_20 = arith.constant 0 : index
    %25 = vector.load %arg9[%c0_19, %c0_20] : memref<8x1xf32, #tpu.memory_space<vmem>>, vector<8x1xf32>
    tpu.vector_store %arg9[%c0_19, %c0_20], %24 {strides = array<i32>} : memref<8x1xf32, #tpu.memory_space<vmem>>, vector<8x1xf32>,
    %c0_i32_21 = arith.constant 0 : i32
    %26 = arith.cmpi eq, %arg1, %c0_i32_21 : i32
    %27 = arith.extui %26 : i1 to i32
    %c0_i32_22 = arith.constant 0 : i32
    %28 = arith.cmpi ne, %27, %c0_i32_22 : i32
    scf.if %28 {
      %29 = arith.extf %4 : vector<8x128xbf16> to vector<8x128xf32>
      %30 = arith.extf %5 : vector<8x128xbf16> to vector<8x128xf32>
      %31 = arith.mulf %29, %30 : vector<8x128xf32>
      %cst_23 = arith.constant dense<0.000000e+00> : vector<8xf32>
      %32 = vector.multi_reduction <add>, %31, %cst_23 [1] : vector<8x128xf32> to vector<8xf32>
      %33 = vector.shape_cast %32 : vector<8xf32> to vector<8x1xf32>
      %c0_24 = arith.constant 0 : index
      %c0_25 = arith.constant 0 : index
      %34 = vector.load %arg8[%c0_24, %c0_25] : memref<8x1xf32, #tpu.memory_space<vmem>>, vector<8x1xf32>
      %c0_26 = arith.constant 0 : index
      %c0_27 = arith.constant 0 : index
      %35 = vector.load %arg9[%c0_26, %c0_27] : memref<8x1xf32, #tpu.memory_space<vmem>>, vector<8x1xf32>
      %36 = math.log %34 : vector<8x1xf32>
      %37 = vector.broadcast %3 : f32 to vector<8x1xf32>
      %38 = arith.addf %37, %36 : vector<8x1xf32>
      %39 = math.log %35 : vector<8x1xf32>
      %40 = vector.broadcast %3 : f32 to vector<8x1xf32>
      %41 = arith.addf %40, %39 : vector<8x1xf32>
      %42 = arith.subf %38, %33 : vector<8x1xf32>
      %43 = arith.subf %41, %33 : vector<8x1xf32>
      %44 = arith.addf %42, %43 : vector<8x1xf32>
      %cst_28 = arith.constant 5.000000e-01 : f32
      %45 = vector.broadcast %cst_28 : f32 to vector<8x1xf32>
      %46 = arith.mulf %45, %44 : vector<8x1xf32>
      %c0_29 = arith.constant 0 : index
      %c0_30 = arith.constant 0 : index
      %47 = vector.load %arg7[%c0_29, %c0_30] : memref<8x1xf32, #tpu.memory_space<vmem>>, vector<8x1xf32>
      tpu.vector_store %arg7[%c0_29, %c0_30], %46 {strides = array<i32>} : memref<8x1xf32, #tpu.memory_space<vmem>>, vector<8x1xf32>,
    } else {
    }
    return
  }
  func.func @transform_0(%arg0: i32, %arg1: i32) -> (i32, i32) {
    %c0_i32 = arith.constant 0 : i32
    %c0_i32_0 = arith.constant 0 : i32
    %c0_i32_1 = arith.constant 0 : i32
    return %c0_i32, %c0_i32_0 : i32, i32
  }
  func.func @transform_1(%arg0: i32, %arg1: i32) -> (i32, i32) {
    %c0_i32 = arith.constant 0 : i32
    %c0_i32_0 = arith.constant 0 : i32
    return %arg0, %c0_i32 : i32, i32
  }
  func.func @transform_2(%arg0: i32, %arg1: i32) -> (i32, i32) {
    %c0_i32 = arith.constant 0 : i32
    %c0_i32_0 = arith.constant 0 : i32
    return %arg0, %c0_i32 : i32, i32
  }
  func.func @transform_3(%arg0: i32, %arg1: i32) -> (i32, i32) {
    %c0_i32 = arith.constant 0 : i32
    %c0_i32_0 = arith.constant 0 : i32
    return %arg1, %c0_i32 : i32, i32
  }
  func.func @transform_4(%arg0: i32, %arg1: i32) -> (i32, i32) {
    %c0_i32 = arith.constant 0 : i32
    %c0_i32_0 = arith.constant 0 : i32
    return %arg1, %c0_i32 : i32, i32
  }
  func.func @transform_5(%arg0: i32, %arg1: i32) -> (i32, i32) {
    %c0_i32 = arith.constant 0 : i32
    %c0_i32_0 = arith.constant 0 : i32
    return %arg0, %c0_i32 : i32, i32
  }
}

</mosaic_0001>

<bundles_post_ra>
// kernel: _infonce_impl.1
= control target key start
LH: loop header
LB: loop body
LE: loop exit
PB: predicated region body
PF: predicated region fallthrough
CT: control target
= control target key end

     0   :  { %11 = vsyncpa [#allocation6], 0  ;;  %s475_s0 = inlined_call_operand.<no memory space> [shape: f32[1,1], index: 0, kind: input, shape index: {}]   ;;  %s476_s1 = inlined_call_operand.hbm [shape: bf16[8,128], index: 1, kind: input, shape index: {}, may-alias: {1,3}]   ;;  %s477_s2 = inlined_call_operand.hbm [shape: bf16[8,128], index: 2, kind: input, shape index: {}, may-alias: {2,4}]   ;;  %s478_s3 = inlined_call_operand.hbm [shape: bf16[8,128], index: 3, kind: input, shape index: {}, may-alias: {1,3}]   ;;  %s479_s4 = inlined_call_operand.hbm [shape: bf16[8,128], index: 4, kind: input, shape index: {}, may-alias: {2,4}]   ;;  %s480_s5 = inlined_call_operand.hbm [shape: f32[8,1], index: 5, kind: output, shape index: {}]  }
   0x1   :  { %12 = vsyncpa [#allocation9], 0 }
   0x2   :  { %13 = vsyncpa [#allocation12], 0 }
   0x3   :  { %14 = vsyncpa [#allocation7], 0  ;;  %s370_s18 = smov [#allocation8]   ;;  %s371_s20 = smov [#allocation5]  }
   0x4   :  { %s33_s19 = sshll.u32 %s370_s18, 4  ;;  %s23_s21 = sshll.u32 %s371_s20, 4  ;;  %s34_s19 = int_to_ptr.vmem [resolvable:$true] %s33_s19  ;;  %s24_s21 = int_to_ptr.vmem [resolvable:$true] %s23_s21 }
   0x5   :  { %s252_s24 = scalar_lea.hbm %s477_s2, 64 }
   0x6   :  { %p253_p0 = scmp.ne.s32.totalorder %s477_s2, %s252_s24  ;;  %p256_p1 = scmp.lt.u32.totalorder %s252_s24, %s477_s2 }
   0x8   :  { %p258_p2 = pnand %p256_p1, %p253_p0 }
   0xa   :  { %261 = shalt.err (!%p258_p2)
}
   0xb   :  { %s262_s29 = scalar_lea.vmem %s34_s19, 64  ;;  %p267_p4 = scmp.lt.s32.totalorder %s34_s19, %s34_s19 }
   0xc   :  { %p263_p3 = scmp.ne.s32.totalorder %s34_s19, %s262_s29  ;;  %p268_p5 = scmp.lt.s32.totalorder %s262_s29, %s262_s29 }
   0xe   :  { %p269_p6 = por %p268_p5, %p267_p4 }
  0x10   :  { %p270_p7 = pnand %p269_p6, %p263_p3 }
  0x12   :  { %273 = shalt.err (!%p270_p7)
}
  0x13   :  { %36 = dma.hbm_to_vmem [thread:$0]  %s477_s2, 64, %s34_s19, [#allocation9]  }
  0x14   :  { %s274_s9 = scalar_lea.hbm %s476_s1, 64 }
  0x15   :  { %p275_p8 = scmp.ne.s32.totalorder %s476_s1, %s274_s9  ;;  %p278_p9 = scmp.lt.u32.totalorder %s274_s9, %s476_s1 }
  0x17   :  { %p280_p10 = pnand %p278_p9, %p275_p8 }
  0x19   :  { %283 = shalt.err (!%p280_p10)
}
  0x1a   :  { %s284_s14 = scalar_lea.vmem %s24_s21, 64  ;;  %p289_p12 = scmp.lt.s32.totalorder %s24_s21, %s24_s21 }
  0x1b   :  { %p285_p11 = scmp.ne.s32.totalorder %s24_s21, %s284_s14  ;;  %p290_p13 = scmp.lt.s32.totalorder %s284_s14, %s284_s14 }
  0x1d   :  { %p291_p0 = por %p290_p13, %p289_p12 }
  0x1f   :  { %p292_p1 = pnand %p291_p0, %p285_p11 }
  0x21   :  { %295 = shalt.err (!%p292_p1)
}
  0x22   :  { %26 = dma.hbm_to_vmem [thread:$0]  %s476_s1, 64, %s24_s21, [#allocation6]  }
  0x23   :  { %s372_s16 = smov [#allocation10]   ;;  %s373_s18 = smov [#allocation11]  }
  0x24   :  { %s43_s17 = sshll.u32 %s372_s16, 4  ;;  %s53_s19 = sshll.u32 %s373_s18, 4  ;;  %s44_s17 = int_to_ptr.vmem [resolvable:$true] %s43_s17  ;;  %s54_s19 = int_to_ptr.vmem [resolvable:$true] %s53_s19 }
  0x25   :  { %s296_s23 = scalar_lea.hbm %s478_s3, 64 }
  0x26   :  { %p297_p2 = scmp.ne.s32.totalorder %s478_s3, %s296_s23  ;;  %p300_p3 = scmp.lt.u32.totalorder %s296_s23, %s478_s3 }
  0x28   :  { %p302_p4 = pnand %p300_p3, %p297_p2 }
  0x2a   :  { %305 = shalt.err (!%p302_p4)
}
  0x2b   :  { %s306_s1 = scalar_lea.vmem %s44_s17, 64  ;;  %p311_p6 = scmp.lt.s32.totalorder %s44_s17, %s44_s17 }
  0x2c   :  { %p307_p5 = scmp.ne.s32.totalorder %s44_s17, %s306_s1  ;;  %p312_p7 = scmp.lt.s32.totalorder %s306_s1, %s306_s1 }
  0x2e   :  { %p313_p8 = por %p312_p7, %p311_p6 }
  0x30   :  { %p314_p9 = pnand %p313_p8, %p307_p5 }
  0x32   :  { %317 = shalt.err (!%p314_p9)
}
  0x33   :  { %46 = dma.hbm_to_vmem [thread:$0]  %s478_s3, 64, %s44_s17, [#allocation9]  }
  0x34   :  { %s318_s6 = scalar_lea.hbm %s479_s4, 64 }
  0x35   :  { %p319_p10 = scmp.ne.s32.totalorder %s479_s4, %s318_s6  ;;  %p322_p11 = scmp.lt.u32.totalorder %s318_s6, %s479_s4 }
  0x37   :  { %p324_p12 = pnand %p322_p11, %p319_p10 }
  0x39   :  { %327 = shalt.err (!%p324_p12)
}
  0x3a   :  { %s328_s11 = scalar_lea.vmem %s54_s19, 64  ;;  %p333_p0 = scmp.lt.s32.totalorder %s54_s19, %s54_s19 }
  0x3b   :  { %p329_p13 = scmp.ne.s32.totalorder %s54_s19, %s328_s11  ;;  %p334_p1 = scmp.lt.s32.totalorder %s328_s11, %s328_s11 }
  0x3d   :  { %p335_p2 = por %p334_p1, %p333_p0 }
  0x3f   :  { %p336_p3 = pnand %p335_p2, %p329_p13 }
  0x41   :  { %339 = shalt.err (!%p336_p3)
}
  0x42   :  { %56 = dma.hbm_to_vmem [thread:$0]  %s479_s4, 64, %s54_s19, [#allocation12]  }
  0x43   :  { %362 = dma.done.wait [#allocation6], 64  }
  0x44   :  { %363 = vsyncadd [#allocation6], 4294967232 }
  0x45   :  { %364 = dma.done.wait [#allocation9], 128  }
  0x46   :  { %365 = vsyncadd [#allocation9], 4294967168 }
  0x47   :  { %366 = dma.done.wait [#allocation12], 64  }
  0x48   :  { %367 = vsyncadd [#allocation12], 4294967232  ;;  %v374_v0 = vmov 0.0   ;;  %vm375_vm0 = vmmov 0   ;;  %v81_v1 = vld [vmem:[#allocation11] sm:$0xf]  ;;  %v163_v8 = vstv %s475_s0 }
  0x49   :  { %225 = vmatprep.subr.bf16.mxu0 %v374_v0  ;;  %231 = vmatprep.subr.bf16.mxu1 %v374_v0  ;;  %v80_v2 = vld [vmem:[#allocation10] sm:$0xf]  ;;  %v78_v3 = vld [vmem:[#allocation5] sm:$0xf]  ;;  %v79_v4 = vld [vmem:[#allocation8] sm:$0xf] }
  0x4a   :  { %227 = vmatprep.mubr.msk.bf16.mxu0 %vm375_vm0, %v374_v0  ;;  %233 = vmatprep.mubr.msk.bf16.mxu1 %vm375_vm0, %v374_v0  ;;  %v186_v5 = vunpack.c.l.bf16 %v78_v3  ;;  %v187_v6 = vunpack.c.l.bf16 %v79_v4  ;;  %vm74_vm1 = vcmask 7168   ;;  %vm167_vm2 = vcmask 64512   ;;  %s376_s0 = smov [#allocation13]  }
  0x4b   :  { %226 = vmatpush3.bf16.xpose.msra.mxu0 %v81_v1  ;;  %232 = vmatpush3.bf16.xpose.msra.mxu1 %v80_v2  ;;  %75 = vst.msk [vmem:[#allocation2] sm:$0xff] %vm74_vm1, %v374_v0  ;;  %76 = vst.msk [vmem:[#allocation3] sm:$0xff] %vm74_vm1, %v374_v0  ;;  %s210_s14 = sshll.u32 %s376_s0, 4  ;;  %s211_s14 = int_to_ptr.vmem [resolvable:$true] %s210_s14 }
  0x4c   :  { %v188_v7 = vmul.f32 %v187_v6, %v186_v5  ;;  %s340_s2 = scalar_lea.vmem %s211_s14, 128  ;;  %p345_p5 = scmp.lt.s32.totalorder %s211_s14, %s211_s14 }
  0x4d   :  { %p341_p4 = scmp.ne.s32.totalorder %s211_s14, %s340_s2  ;;  %p346_p6 = scmp.lt.s32.totalorder %s340_s2, %s340_s2 }
  0x4e   :  { %189 = vadd.xlane.f32.xlu1 %v188_v7 }
  0x4f   :  { %p347_p7 = por %p346_p6, %p345_p5 }
  0x51   :  { %p348_p8 = pnand %p347_p7, %p341_p4 }
  0x52   :  { %228 = vmatmul.mubr.bf16.vlgmr.msra.gmra.mrb[0].mxu0 %v78_v3  ;;  %234 = vmatmul.mubr.bf16.vlgmr.msra.gmra.mrb[0].mxu1 %v79_v4  ;;  %v162_v25 = vld [vmem:[#allocation2] sm:$0xff]  ;;  %v174_v28 = vld [vmem:[#allocation3] sm:$0xff] }
  0xdb   :  { %v190_v38 = vpop.xlane.xlu1 %189 }
 0x125   :  { %v116_v9 = vpop.f32.mrb[0].mxu0  ;;  %v156_v10 = vpop.f32.mrb[0].mxu1 }
 0x126   :  { %v164_v11 = vsub.f32 %v116_v9, %v163_v8  ;;  %v229_v12 = vpop.f32.mrb[1].mxu0  ;;  %v175_v13 = vsub.f32 %v156_v10, %v163_v8  ;;  %v235_v14 = vpop.f32.mrb[1].mxu1 }
 0x127   :  { %v119_v15 = vpop.f32.mrb[2].mxu0  ;;  %v159_v16 = vpop.f32.mrb[2].mxu1 }
 0x128   :  { %v165_v17 = vmul.f32 1.442695, %v164_v11  ;;  %v176_v18 = vmul.f32 1.442695, %v175_v13  ;;  %v230_v19 = vpop.f32.mrb[3].mxu0  ;;  %v236_v20 = vpop.f32.mrb[3].mxu1 }
 0x12a   :  { %244 = vpow2.f32 %v165_v17 }
 0x12b   :  { %246 = vpow2.f32 %v176_v18 }
 0x134   :  { %v245_v21 = vpop.eup %244 }
 0x135   :  { %v247_v22 = vpop.eup %246  ;;  %v168_v23 = vsel %vm167_vm2, %v245_v21, 0.0 }
 0x136   :  { %169 = vadd.xlane.f32.xlu0 %v168_v23  ;;  %v178_v24 = vsel %vm167_vm2, %v247_v22, 0.0 }
 0x13a   :  { %179 = vadd.xlane.f32.xlu0 %v178_v24 }
 0x1c3   :  { %v170_v26 = vpop.xlane.xlu0 %169 }
 0x1c4   :  { %v171_v27 = vadd.f32 %v170_v26, %v162_v25 }
 0x1c6   :  { %173 = vst.msk [vmem:[#allocation2] sm:$0xff] %vm74_vm1, %v171_v27 }
 0x1c7   :  { %v180_v29 = vpop.xlane.xlu0 %179 }
 0x1c8   :  { %v181_v30 = vadd.f32 %v180_v29, %v174_v28 }
 0x1ca   :  { %182 = vst.msk [vmem:[#allocation3] sm:$0xff] %vm74_vm1, %v181_v30 }
 0x1cd   :  { %v191_v31 = vld [vmem:[#allocation2] sm:$0xff] }
 0x1ce   :  { %248 = vlog2.f32 %v191_v31 }
 0x1d1   :  { %v192_v32 = vld [vmem:[#allocation3] sm:$0xff] }
 0x1d2   :  { %250 = vlog2.f32 %v192_v32 }
 0x1d8   :  { %v249_v33 = vpop.eup %248 }
 0x1d9   :  { %v194_v34 = vmul.f32 0.6931472, %v249_v33 }
 0x1db   :  { %v195_v36 = vadd.f32 %v194_v34, %v163_v8 }
 0x1dc   :  { %v251_v35 = vpop.eup %250 }
 0x1dd   :  { %v197_v37 = vmul.f32 0.6931472, %v251_v35  ;;  %v199_v40 = vsub.f32 %v195_v36, %v190_v38 }
 0x1df   :  { %v198_v39 = vadd.f32 %v197_v37, %v163_v8 }
 0x1e1   :  { %v200_v41 = vsub.f32 %v198_v39, %v190_v38 }
 0x1e3   :  { %v201_v42 = vadd.f32 %v200_v41, %v199_v40 }
 0x1e5   :  { %v202_v43 = vmul.f32 0.5, %v201_v42 }
 0x1e7   :  { %203 = vst.msk [vmem:[#allocation13] sm:$0xff] %vm74_vm1, %v202_v43 }
 0x1e8   :  { %351 = shalt.err (!%p348_p8)
}
 0x1e9   :  { %s352_s17 = scalar_lea.hbm %s480_s5, 128 }
 0x1ea   :  { %p353_p9 = scmp.ne.s32.totalorder %s480_s5, %s352_s17  ;;  %p356_p10 = scmp.lt.u32.totalorder %s352_s17, %s480_s5 }
 0x1ec   :  { %p358_p11 = pnand %p356_p10, %p353_p9 }
 0x1ee   :  { %361 = shalt.err (!%p358_p11)
}
 0x1ef   :  { %213 = dma.vmem_to_hbm [thread:$0]  %s211_s14, 128, %s480_s5, [#allocation7]  }
 0x1f0   :  { %368 = dma.done.wait [#allocation7], 128  }
 0x1f1   :  { %369 = vsyncadd [#allocation7], 4294967168 }
 0x1f2   :  { %217 = vsyncpa [#allocation6], 1 }
 0x1f3   :  { %218 = vsyncpa [#allocation9], 1 }
 0x1f4   :  { %219 = vsyncpa [#allocation12], 1 }
 0x1f5   :  { %220 = vsyncpa [#allocation7], 1 }

</bundles_post_ra>
